<compile_context>
chip_gen: v7x
topology: tpu7x:2x2x1
jax: 0.10.0
libtpu: 0.0.40
codegen_flags: <defaults>
</compile_context>

<pallas_src>
import functools

import jax
import jax.numpy as jnp
from jax.experimental import pallas as pl
from jax.experimental.pallas import tpu as pltpu

ALPHA = 0.25
LAMBDA = 0.25

_LANES = 128
_SUBLANES = 8
_TILE_BYTES = 1 << 20   # ~1 MiB per input buffer (double-buffered => ~4 MiB total)


def _general_sanitizer_loss_kernel(sensor_s_ref, sensor_ref,
                                   act_p_ref, act_lab_ref,
                                   sens_p_ref, sens_lab_ref,
                                   other_s_ref, other_ref,
                                   out_ref,
                                   acc_ref,
                                   *, n_sensor, n_other, tail_rows,
                                   needs_tail_mask, alpha, lam):
    t = pl.program_id(0)
    last = pl.num_programs(0) - 1

    @pl.when(t == 0)
    def _init():
        acc_ref[...] = jnp.zeros_like(acc_ref)

    # ---- streaming L1 partial sums over this lane-dense tile ----------------
    a = sensor_s_ref[...].astype(jnp.float32)
    b = sensor_ref[...].astype(jnp.float32)
    acc_rows = acc_ref.shape[0]

    def accumulate(diff):
        if acc_rows == _SUBLANES:
            # (R,128) -> (R/8, 8, 128) is a tile-boundary-preserving reshape;
            # summing the leading axis is pure vreg adds (no XLU reduce per step).
            acc_ref[...] += jnp.sum(diff.reshape(-1, _SUBLANES, _LANES), axis=0)
        else:
            acc_ref[...] += jnp.sum(diff, axis=0, keepdims=True)

    if needs_tail_mask:
        # Hot path stays mask-free; only the (partial) last tile pays for iota/where.
        @pl.when(t != last)
        def _full():
            accumulate(jnp.abs(a - b))

        @pl.when(t == last)
        def _tail():
            d = jnp.abs(a - b)
            ridx = jax.lax.broadcasted_iota(jnp.int32, d.shape, 0)
            accumulate(jnp.where(ridx < tail_rows, d, 0.0))
    else:
        accumulate(jnp.abs(a - b))

    # ---- final step: cross-entropies, physio L1, combine, write scalars -----
    @pl.when(t == last)
    def _finish():
        def cross_entropy(logits_ref, label_ref):
            logits = logits_ref[...].astype(jnp.float32)          # (B, K)
            col = jax.lax.broadcasted_iota(jnp.int32, logits.shape, 1)
            m = jnp.max(logits, axis=-1, keepdims=True)
            lse = jnp.log(jnp.sum(jnp.exp(logits - m), axis=-1, keepdims=True)) + m
            tgt = jnp.sum(jnp.where(col == label_ref[...], logits, 0.0),
                          axis=-1, keepdims=True)                 # logits[i, label[i]]
            return jnp.mean(lse - tgt)

        act_loss = cross_entropy(act_p_ref, act_lab_ref)
        sens_loss = cross_entropy(sens_p_ref, sens_lab_ref)

        sensor_l1 = jnp.sum(acc_ref[...]) * (1.0 / n_sensor)
        physio_diff = jnp.abs(other_s_ref[...].astype(jnp.float32)
                              - other_ref[...].astype(jnp.float32))
        physio_l1 = jnp.sum(physio_diff) * (1.0 / n_other)
        san_mean = 0.5 * (sensor_l1 + physio_l1)                  # san_loss.mean()
        total = lam * act_loss + alpha * sens_loss + (1.0 - (alpha + lam)) * san_mean

        out_ref[0] = total
        out_ref[1] = act_loss
        out_ref[2] = sens_loss


def general_sanitizer_loss(sensor_s, other_s, act_p, sens_p, sensor, act, sens, other):
    """Mirrors GeneralSanitizerLoss.forward (compute path). Returns (total, act_loss, sens_loss)."""
    B = act_p.shape[0]
    A = act_p.shape[-1]
    S = sens_p.shape[-1]
    n_sensor = int(sensor.size)
    n_other = int(other.size)

    # --- big L1 operands: lane-dense (rows, 128) views, native dtype kept -----
    rows = -(-n_sensor // _LANES)
    if n_sensor % _LANES == 0:
        sens_s2 = sensor_s.reshape(rows, _LANES)      # free view
        sens2 = sensor.reshape(rows, _LANES)          # free view
    else:
        pad = rows * _LANES - n_sensor                # rare: pad only to lane boundary
        sens_s2 = jnp.pad(sensor_s.reshape(-1), (0, pad)).reshape(rows, _LANES)
        sens2 = jnp.pad(sensor.reshape(-1), (0, pad)).reshape(rows, _LANES)

    itemsize = max(sens_s2.dtype.itemsize, sens2.dtype.itemsize)
    max_tile_rows = ((_TILE_BYTES // (_LANES * itemsize)) // _SUBLANES) * _SUBLANES
    tile_rows = rows if rows <= max_tile_rows else max_tile_rows
    num_tiles = -(-rows // tile_rows)
    tail_rows = rows - (num_tiles - 1) * tile_rows
    needs_tail_mask = (tail_rows != tile_rows)        # partial last block (OOB rows)
    acc_rows = _SUBLANES if tile_rows % _SUBLANES == 0 else 1

    # --- tiny residents: other pair, logits, labels ---------------------------
    if n_other == 0:
        other_s2 = jnp.zeros((1, 1), jnp.float32)
        other2 = jnp.zeros((1, 1), jnp.float32)
        n_other_eff = 1
    else:
        other_s2 = other_s.reshape(1, -1)
        other2 = other.reshape(1, -1)
        n_other_eff = n_other

    act_lab = act.astype(jnp.int32).reshape(B, 1)
    sens_lab = sens.astype(jnp.int32).reshape(B, 1)

    kernel = functools.partial(
        _general_sanitizer_loss_kernel,
        n_sensor=n_sensor, n_other=n_other_eff, tail_rows=tail_rows,
        needs_tail_mask=needs_tail_mask, alpha=ALPHA, lam=LAMBDA)

    bytes_accessed = int(sens_s2.size * sens_s2.dtype.itemsize
                         + sens2.size * sens2.dtype.itemsize
                         + act_p.size * act_p.dtype.itemsize
                         + sens_p.size * sens_p.dtype.itemsize
                         + other_s2.size * other_s2.dtype.itemsize
                         + other2.size * other2.dtype.itemsize
                         + (act_lab.size + sens_lab.size) * 4 + 3 * 4)
    cost = pl.CostEstimate(flops=int(3 * rows * _LANES + 8 * B * (A + S) + 3 * n_other_eff),
                           transcendentals=int(B * (A + S)),
                           bytes_accessed=bytes_accessed)

    out = pl.pallas_call(
        kernel,
        out_shape=jax.ShapeDtypeStruct((3,), jnp.float32),
        grid=(num_tiles,),
        in_specs=[
            pl.BlockSpec((tile_rows, _LANES), lambda t: (t, 0)),     # sensor_s tiles
            pl.BlockSpec((tile_rows, _LANES), lambda t: (t, 0)),     # sensor tiles
            pl.BlockSpec((B, A), lambda t: (0, 0)),                  # act logits (resident)
            pl.BlockSpec((B, 1), lambda t: (0, 0)),                  # act labels (int32)
            pl.BlockSpec((B, S), lambda t: (0, 0)),                  # sens logits (resident)
            pl.BlockSpec((B, 1), lambda t: (0, 0)),                  # sens labels (int32)
            pl.BlockSpec(other_s2.shape, lambda t: (0, 0)),          # other_s (resident)
            pl.BlockSpec(other2.shape, lambda t: (0, 0)),            # other (resident)
        ],
        out_specs=pl.BlockSpec(memory_space=pltpu.MemorySpace.SMEM),
        scratch_shapes=[pltpu.VMEM((acc_rows, _LANES), jnp.float32)],  # sensor L1 partials
        compiler_params=pltpu.CompilerParams(
            dimension_semantics=("arbitrary",)),
        cost_estimate=cost,
    )(sens_s2, sens2, act_p, act_lab, sens_p, sens_lab, other_s2, other2)

    return out[0], out[1], out[2]


def _reference(sensor_s, other_s, act_p, sens_p, sensor, act, sens, other):
    def ce(logits, labels):
        logits = logits.astype(jnp.float32)
        lse = jax.nn.logsumexp(logits, axis=-1)
        tgt = jnp.take_along_axis(logits, labels[:, None], axis=-1)[:, 0]
        return jnp.mean(lse - tgt)

    sens_loss = ce(sens_p, sens)
    act_loss = ce(act_p, act)
    sensor_loss = jnp.mean(jnp.abs(sensor_s.astype(jnp.float32) - sensor.astype(jnp.float32)))
    physio_loss = jnp.mean(jnp.abs(other_s.astype(jnp.float32) - other.astype(jnp.float32)))
    san_mean = 0.5 * (sensor_loss + physio_loss)
    total = LAMBDA * act_loss + ALPHA * sens_loss + (1.0 - (ALPHA + LAMBDA)) * san_mean
    return total, act_loss, sens_loss


if __name__ == "__main__":
    key = jax.random.PRNGKey(0)
    ks = jax.random.split(key, 8)

    B, C, T = 2, 4, 16   # batch, sensor channels, time steps
    P = 3                # other (physiological) attributes
    A = 5                # activity classes
    S = 2                # sensitive-attribute classes

    sensor = jax.random.normal(ks[0], (B, C, T), jnp.float32)
    sensor_s = jax.random.normal(ks[1], (B, C, T), jnp.float32)
    other = jax.random.normal(ks[2], (B, P), jnp.float32)
    other_s = jax.random.normal(ks[3], (B, P), jnp.float32)
    act_p = jax.random.normal(ks[4], (B, A), jnp.float32)
    sens_p = jax.random.normal(ks[5], (B, S), jnp.float32)
    act = jax.random.randint(ks[6], (B,), 0, A)
    sens = jax.random.randint(ks[7], (B,), 0, S)

    total, act_loss, sens_loss = general_sanitizer_loss(
        sensor_s, other_s, act_p, sens_p, sensor, act, sens, other)
    jax.block_until_ready((total, act_loss, sens_loss))

    ref_total, ref_act, ref_sens = _reference(
        sensor_s, other_s, act_p, sens_p, sensor, act, sens, other)
    assert jnp.allclose(total, ref_total, atol=1e-5), (total, ref_total)
    assert jnp.allclose(act_loss, ref_act, atol=1e-5), (act_loss, ref_act)
    assert jnp.allclose(sens_loss, ref_sens, atol=1e-5), (sens_loss, ref_sens)

    print("KERNEL_OK")
</pallas_src>

<mosaic_0001>
module attributes {stable_mosaic.version = 11 : i64} {
  func.func @_general_sanitizer_loss_kernel(%arg0: i32, %arg1: memref<1x128xf32, #tpu.memory_space<vmem>>, %arg2: memref<1x128xf32, #tpu.memory_space<vmem>>, %arg3: memref<2x5xf32, #tpu.memory_space<vmem>>, %arg4: memref<2x1xi32, #tpu.memory_space<vmem>>, %arg5: memref<2x2xf32, #tpu.memory_space<vmem>>, %arg6: memref<2x1xi32, #tpu.memory_space<vmem>>, %arg7: memref<1x6xf32, #tpu.memory_space<vmem>>, %arg8: memref<1x6xf32, #tpu.memory_space<vmem>>, %arg9: memref<3xf32, #tpu.memory_space<smem>>, %arg10: memref<1x128xf32, #tpu.memory_space<vmem>>) attributes {dimension_semantics = [#tpu.dimension_semantics<arbitrary>], iteration_bounds = array<i64: 1>, scalar_prefetch = 0 : i64, scratch_operands = 1 : i64, tpu.core_type = #tpu.core_type<tc>, window_params = [{transform_indices = @transform_0, window_bounds = array<i64: 1, 128>}, {transform_indices = @transform_1, window_bounds = array<i64: 1, 128>}, {pipeline_mode = #tpu.pipeline_mode<synchronous>, transform_indices = @transform_2, window_bounds = array<i64: 2, 5>}, {pipeline_mode = #tpu.pipeline_mode<synchronous>, transform_indices = @transform_3, window_bounds = array<i64: 2, 1>}, {pipeline_mode = #tpu.pipeline_mode<synchronous>, transform_indices = @transform_4, window_bounds = array<i64: 2, 2>}, {pipeline_mode = #tpu.pipeline_mode<synchronous>, transform_indices = @transform_5, window_bounds = array<i64: 2, 1>}, {pipeline_mode = #tpu.pipeline_mode<synchronous>, transform_indices = @transform_6, window_bounds = array<i64: 1, 6>}, {pipeline_mode = #tpu.pipeline_mode<synchronous>, transform_indices = @transform_7, window_bounds = array<i64: 1, 6>}, {transform_indices = @transform_8, window_bounds = array<i64: 3>}]} {
    %c0_i32 = arith.constant 0 : i32
    %0 = arith.cmpi eq, %arg0, %c0_i32 : i32
    %1 = arith.extui %0 : i1 to i32
    %c0_i32_0 = arith.constant 0 : i32
    %2 = arith.cmpi ne, %1, %c0_i32_0 : i32
    scf.if %2 {
      %cst_10 = arith.constant 0.000000e+00 : f32
      %15 = vector.broadcast %cst_10 : f32 to vector<1x128xf32>
      %c0_11 = arith.constant 0 : index
      %c0_12 = arith.constant 0 : index
      %16 = vector.load %arg10[%c0_11, %c0_12] : memref<1x128xf32, #tpu.memory_space<vmem>>, vector<1x128xf32>
      tpu.vector_store %arg10[%c0_11, %c0_12], %15 {strides = array<i32>} : memref<1x128xf32, #tpu.memory_space<vmem>>, vector<1x128xf32>,
    } else {
    }
    %c0 = arith.constant 0 : index
    %c0_1 = arith.constant 0 : index
    %3 = vector.load %arg1[%c0, %c0_1] : memref<1x128xf32, #tpu.memory_space<vmem>>, vector<1x128xf32>
    %c0_2 = arith.constant 0 : index
    %c0_3 = arith.constant 0 : index
    %4 = vector.load %arg2[%c0_2, %c0_3] : memref<1x128xf32, #tpu.memory_space<vmem>>, vector<1x128xf32>
    %5 = arith.subf %3, %4 : vector<1x128xf32>
    %6 = math.absf %5 : vector<1x128xf32>
    %c0_4 = arith.constant 0 : index
    %c0_5 = arith.constant 0 : index
    %7 = vector.load %arg10[%c0_4, %c0_5] : memref<1x128xf32, #tpu.memory_space<vmem>>, vector<1x128xf32>
    %cst = arith.constant dense<0.000000e+00> : vector<128xf32>
    %8 = vector.multi_reduction <add>, %6, %cst [0] : vector<1x128xf32> to vector<128xf32>
    %9 = vector.shape_cast %8 : vector<128xf32> to vector<1x128xf32>
    %10 = arith.addf %7, %9 : vector<1x128xf32>
    %c0_6 = arith.constant 0 : index
    %c0_7 = arith.constant 0 : index
    %11 = vector.load %arg10[%c0_6, %c0_7] : memref<1x128xf32, #tpu.memory_space<vmem>>, vector<1x128xf32>
    tpu.vector_store %arg10[%c0_6, %c0_7], %10 {strides = array<i32>} : memref<1x128xf32, #tpu.memory_space<vmem>>, vector<1x128xf32>,
    %c0_i32_8 = arith.constant 0 : i32
    %12 = arith.cmpi eq, %arg0, %c0_i32_8 : i32
    %13 = arith.extui %12 : i1 to i32
    %c0_i32_9 = arith.constant 0 : i32
    %14 = arith.cmpi ne, %13, %c0_i32_9 : i32
    scf.if %14 {
      %c0_10 = arith.constant 0 : index
      %c0_11 = arith.constant 0 : index
      %15 = vector.load %arg3[%c0_10, %c0_11] : memref<2x5xf32, #tpu.memory_space<vmem>>, vector<2x5xf32>
      %16 = tpu.iota {dimensions = array<i32: 1>} : vector<2x5xi32>
      %cst_12 = arith.constant dense<0xFF800000> : vector<2xf32>
      %17 = vector.multi_reduction <maximumf>, %15, %cst_12 [1] : vector<2x5xf32> to vector<2xf32>
      %18 = vector.shape_cast %17 : vector<2xf32> to vector<2x1xf32>
      %19 = vector.broadcast %18 : vector<2x1xf32> to vector<2x5xf32>
      %20 = arith.subf %15, %19 : vector<2x5xf32>
      %21 = math.exp %20 : vector<2x5xf32>
      %cst_13 = arith.constant dense<0.000000e+00> : vector<2xf32>
      %22 = vector.multi_reduction <add>, %21, %cst_13 [1] : vector<2x5xf32> to vector<2xf32>
      %23 = vector.shape_cast %22 : vector<2xf32> to vector<2x1xf32>
      %24 = math.log %23 : vector<2x1xf32>
      %25 = arith.addf %24, %18 : vector<2x1xf32>
      %c0_14 = arith.constant 0 : index
      %c0_15 = arith.constant 0 : index
      %26 = vector.load %arg4[%c0_14, %c0_15] : memref<2x1xi32, #tpu.memory_space<vmem>>, vector<2x1xi32>
      %27 = vector.broadcast %26 : vector<2x1xi32> to vector<2x5xi32>
      %28 = arith.cmpi eq, %16, %27 : vector<2x5xi32>
      %cst_16 = arith.constant 0.000000e+00 : f32
      %29 = vector.broadcast %cst_16 : f32 to vector<2x5xf32>
      %30 = arith.select %28, %15, %29 : vector<2x5xi1>, vector<2x5xf32>
      %cst_17 = arith.constant dense<0.000000e+00> : vector<2xf32>
      %31 = vector.multi_reduction <add>, %30, %cst_17 [1] : vector<2x5xf32> to vector<2xf32>
      %32 = vector.shape_cast %31 : vector<2xf32> to vector<2x1xf32>
      %33 = arith.subf %25, %32 : vector<2x1xf32>
      %34 = vector.shape_cast %33 : vector<2x1xf32> to vector<1x2x1xf32>
      %cst_18 = arith.constant dense<0.000000e+00> : vector<1xf32>
      %35 = vector.multi_reduction <add>, %34, %cst_18 [1, 2] : vector<1x2x1xf32> to vector<1xf32>
      %36 = vector.shape_cast %35 : vector<1xf32> to vector<1x1x1xf32>
      %37 = vector.extract %36[0, 0, 0] : f32 from vector<1x1x1xf32>
      %cst_19 = arith.constant 2.000000e+00 : f32
      %38 = arith.divf %37, %cst_19 : f32
      %c0_20 = arith.constant 0 : index
      %c0_21 = arith.constant 0 : index
      %39 = vector.load %arg5[%c0_20, %c0_21] : memref<2x2xf32, #tpu.memory_space<vmem>>, vector<2x2xf32>
      %40 = tpu.iota {dimensions = array<i32: 1>} : vector<2x2xi32>
      %cst_22 = arith.constant dense<0xFF800000> : vector<2xf32>
      %41 = vector.multi_reduction <maximumf>, %39, %cst_22 [1] : vector<2x2xf32> to vector<2xf32>
      %42 = vector.shape_cast %41 : vector<2xf32> to vector<2x1xf32>
      %43 = vector.broadcast %42 : vector<2x1xf32> to vector<2x2xf32>
      %44 = arith.subf %39, %43 : vector<2x2xf32>
      %45 = math.exp %44 : vector<2x2xf32>
      %cst_23 = arith.constant dense<0.000000e+00> : vector<2xf32>
      %46 = vector.multi_reduction <add>, %45, %cst_23 [1] : vector<2x2xf32> to vector<2xf32>
      %47 = vector.shape_cast %46 : vector<2xf32> to vector<2x1xf32>
      %48 = math.log %47 : vector<2x1xf32>
      %49 = arith.addf %48, %42 : vector<2x1xf32>
      %c0_24 = arith.constant 0 : index
      %c0_25 = arith.constant 0 : index
      %50 = vector.load %arg6[%c0_24, %c0_25] : memref<2x1xi32, #tpu.memory_space<vmem>>, vector<2x1xi32>
      %51 = vector.broadcast %50 : vector<2x1xi32> to vector<2x2xi32>
      %52 = arith.cmpi eq, %40, %51 : vector<2x2xi32>
      %cst_26 = arith.constant 0.000000e+00 : f32
      %53 = vector.broadcast %cst_26 : f32 to vector<2x2xf32>
      %54 = arith.select %52, %39, %53 : vector<2x2xi1>, vector<2x2xf32>
      %cst_27 = arith.constant dense<0.000000e+00> : vector<2xf32>
      %55 = vector.multi_reduction <add>, %54, %cst_27 [1] : vector<2x2xf32> to vector<2xf32>
      %56 = vector.shape_cast %55 : vector<2xf32> to vector<2x1xf32>
      %57 = arith.subf %49, %56 : vector<2x1xf32>
      %58 = vector.shape_cast %57 : vector<2x1xf32> to vector<1x2x1xf32>
      %cst_28 = arith.constant dense<0.000000e+00> : vector<1xf32>
      %59 = vector.multi_reduction <add>, %58, %cst_28 [1, 2] : vector<1x2x1xf32> to vector<1xf32>
      %60 = vector.shape_cast %59 : vector<1xf32> to vector<1x1x1xf32>
      %61 = vector.extract %60[0, 0, 0] : f32 from vector<1x1x1xf32>
      %cst_29 = arith.constant 2.000000e+00 : f32
      %62 = arith.divf %61, %cst_29 : f32
      %c0_30 = arith.constant 0 : index
      %c0_31 = arith.constant 0 : index
      %63 = vector.load %arg10[%c0_30, %c0_31] : memref<1x128xf32, #tpu.memory_space<vmem>>, vector<1x128xf32>
      %64 = vector.shape_cast %63 : vector<1x128xf32> to vector<1x1x128xf32>
      %cst_32 = arith.constant dense<0.000000e+00> : vector<1xf32>
      %65 = vector.multi_reduction <add>, %64, %cst_32 [1, 2] : vector<1x1x128xf32> to vector<1xf32>
      %66 = vector.shape_cast %65 : vector<1xf32> to vector<1x1x1xf32>
      %67 = vector.extract %66[0, 0, 0] : f32 from vector<1x1x1xf32>
      %cst_33 = arith.constant 7.812500e-03 : f32
      %68 = arith.mulf %67, %cst_33 : f32
      %c0_34 = arith.constant 0 : index
      %c0_35 = arith.constant 0 : index
      %69 = vector.load %arg7[%c0_34, %c0_35] : memref<1x6xf32, #tpu.memory_space<vmem>>, vector<1x6xf32>
      %c0_36 = arith.constant 0 : index
      %c0_37 = arith.constant 0 : index
      %70 = vector.load %arg8[%c0_36, %c0_37] : memref<1x6xf32, #tpu.memory_space<vmem>>, vector<1x6xf32>
      %71 = arith.subf %69, %70 : vector<1x6xf32>
      %72 = math.absf %71 : vector<1x6xf32>
      %73 = vector.shape_cast %72 : vector<1x6xf32> to vector<1x1x6xf32>
      %cst_38 = arith.constant dense<0.000000e+00> : vector<1xf32>
      %74 = vector.multi_reduction <add>, %73, %cst_38 [1, 2] : vector<1x1x6xf32> to vector<1xf32>
      %75 = vector.shape_cast %74 : vector<1xf32> to vector<1x1x1xf32>
      %76 = vector.extract %75[0, 0, 0] : f32 from vector<1x1x1xf32>
      %cst_39 = arith.constant 0.166666672 : f32
      %77 = arith.mulf %76, %cst_39 : f32
      %78 = arith.addf %68, %77 : f32
      %cst_40 = arith.constant 5.000000e-01 : f32
      %79 = arith.mulf %cst_40, %78 : f32
      %cst_41 = arith.constant 2.500000e-01 : f32
      %80 = arith.mulf %cst_41, %38 : f32
      %cst_42 = arith.constant 2.500000e-01 : f32
      %81 = arith.mulf %cst_42, %62 : f32
      %82 = arith.addf %80, %81 : f32
      %cst_43 = arith.constant 5.000000e-01 : f32
      %83 = arith.mulf %cst_43, %79 : f32
      %84 = arith.addf %82, %83 : f32
      %c0_44 = arith.constant 0 : index
      %85 = memref.load %arg9[%c0_44] : memref<3xf32, #tpu.memory_space<smem>>
      memref.store %84, %arg9[%c0_44] : memref<3xf32, #tpu.memory_space<smem>>
      %c1 = arith.constant 1 : index
      %86 = memref.load %arg9[%c1] : memref<3xf32, #tpu.memory_space<smem>>
      memref.store %38, %arg9[%c1] : memref<3xf32, #tpu.memory_space<smem>>
      %c2 = arith.constant 2 : index
      %87 = memref.load %arg9[%c2] : memref<3xf32, #tpu.memory_space<smem>>
      memref.store %62, %arg9[%c2] : memref<3xf32, #tpu.memory_space<smem>>
    } else {
    }
    return
  }
  func.func @transform_0(%arg0: i32) -> (i32, i32) {
    %c0_i32 = arith.constant 0 : i32
    %c0_i32_0 = arith.constant 0 : i32
    return %arg0, %c0_i32 : i32, i32
  }
  func.func @transform_1(%arg0: i32) -> (i32, i32) {
    %c0_i32 = arith.constant 0 : i32
    %c0_i32_0 = arith.constant 0 : i32
    return %arg0, %c0_i32 : i32, i32
  }
  func.func @transform_2(%arg0: i32) -> (i32, i32) {
    %c0_i32 = arith.constant 0 : i32
    %c0_i32_0 = arith.constant 0 : i32
    %c0_i32_1 = arith.constant 0 : i32
    return %c0_i32, %c0_i32_0 : i32, i32
  }
  func.func @transform_3(%arg0: i32) -> (i32, i32) {
    %c0_i32 = arith.constant 0 : i32
    %c0_i32_0 = arith.constant 0 : i32
    %c0_i32_1 = arith.constant 0 : i32
    return %c0_i32, %c0_i32_0 : i32, i32
  }
  func.func @transform_4(%arg0: i32) -> (i32, i32) {
    %c0_i32 = arith.constant 0 : i32
    %c0_i32_0 = arith.constant 0 : i32
    %c0_i32_1 = arith.constant 0 : i32
    return %c0_i32, %c0_i32_0 : i32, i32
  }
  func.func @transform_5(%arg0: i32) -> (i32, i32) {
    %c0_i32 = arith.constant 0 : i32
    %c0_i32_0 = arith.constant 0 : i32
    %c0_i32_1 = arith.constant 0 : i32
    return %c0_i32, %c0_i32_0 : i32, i32
  }
  func.func @transform_6(%arg0: i32) -> (i32, i32) {
    %c0_i32 = arith.constant 0 : i32
    %c0_i32_0 = arith.constant 0 : i32
    %c0_i32_1 = arith.constant 0 : i32
    return %c0_i32, %c0_i32_0 : i32, i32
  }
  func.func @transform_7(%arg0: i32) -> (i32, i32) {
    %c0_i32 = arith.constant 0 : i32
    %c0_i32_0 = arith.constant 0 : i32
    %c0_i32_1 = arith.constant 0 : i32
    return %c0_i32, %c0_i32_0 : i32, i32
  }
  func.func @transform_8(%arg0: i32) -> i32 {
    %c0_i32 = arith.constant 0 : i32
    %c0_i32_0 = arith.constant 0 : i32
    return %c0_i32 : i32
  }
}

</mosaic_0001>

<bundles_post_ra>
// kernel: tpu_custom_call.1
= control target key start
LH: loop header
LB: loop body
LE: loop exit
PB: predicated region body
PF: predicated region fallthrough
CT: control target
= control target key end

     0   :  { %vm49_vm0 = vcmask 33792   ;;  %vm87_vm1 = vcmask 9216   ;;  %v211_v4 = vmov 0   ;;  %s301_s0 = inlined_call_operand.vmem [shape: f32[1,128], index: 0, kind: input, shape index: {}]   ;;  %s302_s1 = inlined_call_operand.vmem [shape: f32[1,128], index: 1, kind: input, shape index: {}]   ;;  %s303_s2 = inlined_call_operand.vmem [shape: f32[2,5], index: 2, kind: input, shape index: {}]   ;;  %s304_s3 = inlined_call_operand.vmem [shape: s32[2,1], index: 3, kind: input, shape index: {}]   ;;  %s305_s4 = inlined_call_operand.vmem [shape: f32[2,2], index: 4, kind: input, shape index: {}]   ;;  %s306_s5 = inlined_call_operand.vmem [shape: s32[2,1], index: 5, kind: input, shape index: {}]   ;;  %s307_s6 = inlined_call_operand.vmem [shape: f32[1,6], index: 6, kind: input, shape index: {}]   ;;  %s308_s7 = inlined_call_operand.vmem [shape: f32[1,6], index: 7, kind: input, shape index: {}]   ;;  %s309_s8 = inlined_call_operand.hbm [shape: f32[3], index: 8, kind: output, shape index: {}]  }
   0x1   :  { %v46_v0 = vld [vmem:[%s303_s2] sm:$0x3]  ;;  %189 = vset.pattern.permute.xlu1 %v211_v4 }
   0x2   :  { %v86_v1 = vld [vmem:[%s305_s4] sm:$0x3]  ;;  %v50_v2 = vsel %vm49_vm0, %v46_v0, -inf }
   0x3   :  { %v62_v3 = vld [vmem:[%s304_s3] sm:$0x3]  ;;  %51 = vmax.xlane.f32.xlu0 %v50_v2 }
   0x4   :  { %13 = vsyncpa [#allocation4], 0  ;;  %v88_v5 = vsel %vm87_vm1, %v86_v1, -inf  ;;  %64 = vperm.xlu1 %189, %v62_v3   ;;  %190 = vset.pattern.permute.xlu0 %v211_v4  ;;  %v100_v6 = vld [vmem:[%s306_s5] sm:$0x3]  ;;  %v47_v11 = vlaneseq  ;;  %v212_v24 = vmov 0.0  }
   0x5   :  { %34 = vst [vmem:[#allocation2] sm:$0x1] %v212_v24  ;;  %v35_v26 = vld [vmem:[%s301_s0] sm:$0x1]  ;;  %vm124_vm4 = vcmask 1040384   ;;  %vm72_vm5 = vcmask 1024  }
   0x6   :  { %v48_v15 = vand.u32 127, %v47_v11  ;;  %v36_v27 = vld [vmem:[%s302_s1] sm:$0x1]  ;;  %vm140_vm6 = vcmask 40960   ;;  %s199_s30 = scalar_lea.hbm %s309_s8, 16 }
   0x7   :  { %89 = vmax.xlane.f32.xlu0 %v88_v5  ;;  %v37_v28 = vsub.f32 %v35_v26, %v36_v27  ;;  %v136_v39 = vld [vmem:[%s307_s6] sm:$0x1]  ;;  %p200_p0 = scmp.ne.s32.totalorder %s309_s8, %s199_s30  ;;  %p203_p1 = scmp.lt.u32.totalorder %s199_s30, %s309_s8 }
   0x8   :  { %102 = vperm.xlu1 %189, %v100_v6   ;;  %v137_v40 = vld [vmem:[%s308_s7] sm:$0x1] }
   0x9   :  { %v38_v29 = vand.u32 2147483647, %v37_v28  ;;  %v138_v45 = vsub.f32 %v136_v39, %v137_v40  ;;  %p205_p2 = pnand %p203_p1, %p200_p0 }
   0xb   :  { %v139_v50 = vand.u32 2147483647, %v138_v45 }
   0xc   :  { %v39_v30 = vld [vmem:[#allocation2] sm:$0x1] }
   0xd   :  { %v41_v31 = vadd.f32 %v39_v30, %v38_v29  ;;  %v141_v52 = vsel %vm140_vm6, %v139_v50, 0.0 }
   0xf   :  { %42 = vst [vmem:[#allocation2] sm:$0x1] %v41_v31 }
  0x16   :  { %v123_v32 = vld [vmem:[#allocation2] sm:$0x1] }
  0x17   :  { %v125_v33 = vsel %vm124_vm4, %v123_v32, 0.0 }
  0x83   :  { %v65_v14 = vpop.permute.xlu1 %64 }
  0x84   :  { %vm66_vm2 = vcmp.eq.s32.totalorder %v48_v15, %v65_v14 }
  0x85   :  { %v67_v18 = vsel %vm66_vm2, %v46_v0, 0.0 }
  0x86   :  { %v68_v20 = vsel %vm49_vm0, %v67_v18, 0.0 }
  0x87   :  { %v103_v16 = vpop.permute.xlu1 %102 }
  0x88   :  { %vm104_vm3 = vcmp.eq.s32.totalorder %v48_v15, %v103_v16 }
  0x89   :  { %v105_v22 = vsel %vm104_vm3, %v86_v1, 0.0 }
  0x8a   :  { %v106_v25 = vsel %vm87_vm1, %v105_v22, 0.0 }
  0x90   :  { %v52_v7 = vpop.xlane.xlu0 %51 }
  0x91   :  { %v53_v8 = vsub.f32 %v46_v0, %v52_v7 }
  0x93   :  { %v54_v9 = vmul.f32 1.442695, %v53_v8 }
  0x94   :  { %v90_v10 = vpop.xlane.xlu0 %89 }
  0x95   :  { %191 = vpow2.f32 %v54_v9  ;;  %v91_v12 = vsub.f32 %v86_v1, %v90_v10 }
  0x97   :  { %v92_v13 = vmul.f32 1.442695, %v91_v12 }
  0x99   :  { %193 = vpow2.f32 %v92_v13 }
  0x9f   :  { %v192_v17 = vpop.eup %191 }
  0xa0   :  { %v56_v19 = vsel %vm49_vm0, %v192_v17, 0.0 }
  0xa1   :  { %57 = vadd.xlane.f32.xlu0 %v56_v19 }
  0xa3   :  { %v194_v21 = vpop.eup %193 }
  0xa4   :  { %v94_v23 = vsel %vm87_vm1, %v194_v21, 0.0 }
  0xa5   :  { %95 = vadd.xlane.f32.xlu1 %v94_v23  ;;  %69 = vadd.xlane.f32.xlu0 %v68_v20 }
  0xa9   :  { %107 = vadd.xlane.f32.xlu0 %v106_v25 }
  0xad   :  { %126 = vadd.xlane.f32.xlu0 %v125_v33 }
 0x12e   :  { %v58_v34 = vpop.xlane.xlu0 %57 }
 0x12f   :  { %195 = vlog2.f32 %v58_v34 }
 0x132   :  { %v96_v35 = vpop.xlane.xlu1 %95  ;;  %v70_v38 = vpop.xlane.xlu0 %69 }
 0x133   :  { %197 = vlog2.f32 %v96_v35 }
 0x136   :  { %v108_v48 = vpop.xlane.xlu0 %107 }
 0x139   :  { %v196_v36 = vpop.eup %195 }
 0x13a   :  { %v60_v37 = vmul.f32 0.6931472, %v196_v36  ;;  %v127_v53 = vpop.xlane.xlu0 %126 }
 0x13b   :  { %v128_v54 = vrot.slane %v127_v53, 4 }
 0x13c   :  { %v61_v41 = vadd.f32 %v60_v37, %v52_v7 }
 0x13d   :  { %v198_v42 = vpop.eup %197  ;;  %v129_v55 = vadd.f32 %v128_v54, %v127_v53 }
 0x13e   :  { %v98_v43 = vmul.f32 0.6931472, %v198_v42  ;;  %v71_v44 = vsub.f32 %v61_v41, %v70_v38 }
 0x13f   :  { %v130_v59 = vrot.slane %v129_v55, 2 }
 0x140   :  { %v99_v46 = vadd.f32 %v98_v43, %v90_v10  ;;  %v73_v47 = vsel %vm72_vm5, %v71_v44, 0.0 }
 0x141   :  { %74 = vadd.xlane.f32.xlu0 %v73_v47  ;;  %v131_v2 = vadd.f32 %v130_v59, %v129_v55 }
 0x142   :  { %v109_v49 = vsub.f32 %v99_v46, %v108_v48 }
 0x143   :  { %v132_v9 = vrot.slane %v131_v2, 1 }
 0x144   :  { %v110_v51 = vsel %vm72_vm5, %v109_v49, 0.0 }
 0x145   :  { %111 = vadd.xlane.f32.xlu0 %v110_v51  ;;  %v133_v14 = vadd.f32 %v132_v9, %v131_v2 }
 0x149   :  { %142 = vadd.xlane.f32.xlu0 %v141_v52 }
 0x1ce   :  { %v75_v56 = vpop.xlane.xlu0 %74 }
 0x1cf   :  { %v76_v57 = vrot.slane %v75_v56, 4 }
 0x1d1   :  { %v77_v58 = vadd.f32 %v76_v57, %v75_v56 }
 0x1d2   :  { %v112_v60 = vpop.xlane.xlu0 %111 }
 0x1d3   :  { %v78_v61 = vrot.slane %v77_v58, 2  ;;  %v113_v62 = vrot.slane %v112_v60, 4 }
 0x1d5   :  { %v114_v63 = vadd.f32 %v113_v62, %v112_v60  ;;  %v79_v0 = vadd.f32 %v78_v61, %v77_v58 }
 0x1d6   :  { %v143_v1 = vpop.xlane.xlu0 %142 }
 0x1d7   :  { %v115_v3 = vrot.slane %v114_v63, 2  ;;  %v144_v4 = vrot.slane %v143_v1, 4  ;;  %v80_v5 = vrot.slane %v79_v0, 1 }
 0x1d9   :  { %v145_v6 = vadd.f32 %v144_v4, %v143_v1  ;;  %v81_v7 = vadd.f32 %v80_v5, %v79_v0  ;;  %v116_v8 = vadd.f32 %v115_v3, %v114_v63 }
 0x1db   :  { %v146_v10 = vrot.slane %v145_v6, 2  ;;  %178 = vpush %v81_v7  ;;  %v117_v11 = vrot.slane %v116_v8, 1 }
 0x1dd   :  { %v147_v12 = vadd.f32 %v146_v10, %v145_v6  ;;  %v118_v13 = vadd.f32 %v117_v11, %v116_v8 }
 0x1df   :  { %180 = vpush %v118_v13  ;;  %v148_v15 = vrot.slane %v147_v12, 1 }
 0x1e0   :  { %182 = vpush %v133_v14 }
 0x1e1   :  { %v149_v16 = vadd.f32 %v148_v15, %v147_v12 }
 0x1e3   :  { %184 = vpush %v149_v16 }
 0x20c   :  { %s179_s6 = spop %178 }
 0x20d   :  { %s85_s7 = smul.f32 0.5, %s179_s6 }
 0x20f   :  { %162 = sst [smem:[#allocation3 + $0x1]] %s85_s7  ;;  %s154_s23 = smul.f32 0.25, %s85_s7 }
 0x210   :  { %s181_s15 = spop %180 }
 0x211   :  { %s122_s16 = smul.f32 0.5, %s181_s15  ;;  %s183_s17 = spop %182 }
 0x212   :  { %s135_s18 = smul.f32 0.0078125, %s183_s17 }
 0x213   :  { %164 = sst [smem:[#allocation3 + $0x2]] %s122_s16  ;;  %s155_s21 = smul.f32 0.25, %s122_s16 }
 0x214   :  { %s185_s19 = spop %184 }
 0x215   :  { %s151_s20 = smul.f32 0.16666667, %s185_s19  ;;  %s156_s25 = sadd.f32 %s155_s21, %s154_s23 }
 0x217   :  { %s152_s22 = sadd.f32 %s151_s20, %s135_s18 }
 0x219   :  { %s153_s24 = smul.f32 0.5, %s152_s22 }
 0x21b   :  { %s157_s26 = smul.f32 0.5, %s153_s24 }
 0x21d   :  { %s158_s27 = sadd.f32 %s157_s26, %s156_s25 }
 0x21f   :  { %160 = sst [smem:[#allocation3]] %s158_s27 }
 0x220   :  { %208 = shalt.err (!%p205_p2)
}
 0x221   :  { %s213_s3 = smov [#allocation3]  }
 0x222   :  { %172 = dma.smem_to_hbm %s213_s3, 16, %s309_s8, [#allocation4]  }
 0x223   :  { %209 = dma.done.wait [#allocation4], 16  }
 0x224   :  { %210 = vsyncadd [#allocation4], 4294967280 }
 0x225   :  { %176 = sfence }
 0x226   :  { %177 = vsyncpa [#allocation4], 1 }

</bundles_post_ra>
